<compile_context>
chip_gen: v7x
topology: tpu7x:2x2x1
jax: 0.10.0
libtpu: 0.0.40
codegen_flags: <defaults>
</compile_context>

<pallas_src>
import functools

import jax
import jax.numpy as jnp
from jax import lax
from jax.experimental import pallas as pl
from jax.experimental.pallas import tpu as pltpu


def _round_up(x, m):
    return ((x + m - 1) // m) * m


# ---------------------------------------------------------------------------
# Shared finalize: (TB, E) bag means -> fc_out -> lane-dense (TB, Cp) store.
# ---------------------------------------------------------------------------
def _project_and_store(acc_ref, w_ref, b_ref, out_ref):
    # mean @ W^T + b, with W kept in PyTorch (Cp, E) layout (NT contraction).
    # For larger E/C, cast operands to bf16 here (MXU-native on v6e/v7x); at
    # (8,32)@(32,128) it is irrelevant, so stay f32.
    out = lax.dot_general(
        acc_ref[...], w_ref[...],
        dimension_numbers=(((1,), (1,)), ((), ())),
        preferred_element_type=jnp.float32)
    out_ref[...] = (out + b_ref[...]).astype(out_ref.dtype)


# ---------------------------------------------------------------------------
# Path A: embedding table resident in VMEM (small tables).
# ---------------------------------------------------------------------------
def _embedbag_fc_kernel_resident(starts_ref,   # SMEM (B_pad+1,) int32 bag offsets
                                 src_ref,      # SMEM (L,) int32 token ids
                                 emb_ref,      # VMEM (V, 1, E) f32 resident table
                                 w_ref,        # VMEM (Cp, E) f32 fc_out weight
                                 b_ref,        # VMEM (1, Cp) f32 fc_out bias
                                 out_ref,      # VMEM (TB, Cp) f32 output tile
                                 acc_ref,      # VMEM (TB, E) f32 bag means
                                 *, padding_idx, tb):
    g = pl.program_id(0)
    b0 = g * tb
    e = acc_ref.shape[1]

    for i in range(tb):                        # static unroll over the bag tile
        start = starts_ref[b0 + i]
        bag_len = starts_ref[b0 + i + 1] - start

        def body(t, carry):
            s_vec, cnt = carry
            tok = src_ref[start + t]
            valid = tok != padding_idx
            row = emb_ref[tok]                 # (1, E), dynamic leading-axis gather
            s_vec = s_vec + row * valid.astype(jnp.float32)
            cnt = cnt + valid.astype(jnp.int32)
            return s_vec, cnt

        # Dynamic trip count: padded / short bags never iterate extra slots.
        s_vec, cnt = lax.fori_loop(
            0, bag_len, body,
            (jnp.zeros((1, e), jnp.float32), jnp.zeros((), jnp.int32)))
        inv = 1.0 / jnp.maximum(cnt, 1).astype(jnp.float32)
        acc_ref[i:i + 1, :] = s_vec * inv

    _project_and_store(acc_ref, w_ref, b_ref, out_ref)


# ---------------------------------------------------------------------------
# Path B: embedding table in HBM; manual double-buffered row gather.
# ---------------------------------------------------------------------------
def _embedbag_fc_kernel_hbm(starts_ref,        # SMEM (B_pad+1,) int32
                            src_ref,           # SMEM (L,) int32
                            emb_hbm,           # ANY  (V, 1, E) f32, stays in HBM
                            w_ref,             # VMEM (Cp, E) f32
                            b_ref,             # VMEM (1, Cp) f32
                            out_ref,           # VMEM (TB, Cp) f32
                            acc_ref,           # VMEM (TB, E) f32 bag means
                            bagsum_ref,        # VMEM (1, E) f32 current bag sum
                            cnt_ref,           # SMEM (1,) int32 current bag count
                            rowbuf,            # VMEM (2, 1, E) f32 double buffer
                            sem,               # DMA sems (2,)
                            *, padding_idx, tb):
    g = pl.program_id(0)
    b0 = g * tb

    for i in range(tb):                        # static unroll over the bag tile
        start = starts_ref[b0 + i]
        bag_len = starts_ref[b0 + i + 1] - start

        bagsum_ref[...] = jnp.zeros_like(bagsum_ref)
        cnt_ref[0] = 0

        @pl.when(bag_len > 0)
        def _prime():
            pltpu.make_async_copy(emb_hbm.at[src_ref[start]],
                                  rowbuf.at[0], sem.at[0]).start()

        @pl.loop(0, bag_len)                   # dynamic trip count, no padded tail
        def _tok(t):
            slot = t & 1
            # Scalar reads from SMEM BEFORE the DMA wait (keeps sst->sld
            # forwarding on the scalar core intact).
            tok = src_ref[start + t]
            valid = tok != padding_idx
            pltpu.make_async_copy(emb_hbm.at[0], rowbuf.at[slot],
                                  sem.at[slot]).wait()

            @pl.when(t + 1 < bag_len)
            def _fetch_next():
                pltpu.make_async_copy(emb_hbm.at[src_ref[start + t + 1]],
                                      rowbuf.at[1 - slot],
                                      sem.at[1 - slot]).start()

            bagsum_ref[...] = bagsum_ref[...] + rowbuf[slot] * valid.astype(jnp.float32)
            cnt_ref[0] = cnt_ref[0] + valid.astype(jnp.int32)

        inv = 1.0 / jnp.maximum(cnt_ref[0], 1).astype(jnp.float32)
        acc_ref[i:i + 1, :] = bagsum_ref[...] * inv

    _project_and_store(acc_ref, w_ref, b_ref, out_ref)


# ------------------------------ Python wrapper -------------------------------
def text_classifier_forward(src, offsets, emb_table, fc_w, fc_b, padding_idx,
                            *, bags_per_step=8, table_path="auto"):
    """EmbeddingBag(mode='mean', padding_idx) + fc_out as one Pallas TPU kernel.

    src:       (L,) int token ids (flat stream)
    offsets:   (B,) int ascending bag start offsets (torch convention)
    emb_table: (V, E) f32
    fc_w:      (C, E) f32  (PyTorch Linear layout)
    fc_b:      (C,)   f32
    table_path: "auto" | "resident" | "hbm"
    Returns (B, C) f32.  Jit-compatible: offsets may be traced.
    """
    L = int(src.shape[0])
    B = int(offsets.shape[0])
    V, E = map(int, emb_table.shape)
    C = int(fc_w.shape[0])
    LANES, SUBLANES = 128, 8

    TB = _round_up(max(int(bags_per_step), 1), SUBLANES)   # sublane-dense tile
    B_pad = _round_up(max(B, 1), TB)
    Cp = _round_up(C, LANES)

    # --- scalar-prefetch operands (SMEM) -------------------------------------
    # Padded bags (b >= B) get start == end == L, i.e. length 0.
    starts_ext = jnp.concatenate(
        [offsets.astype(jnp.int32),
         jnp.full((B_pad - B + 1,), L, dtype=jnp.int32)])          # (B_pad+1,)
    src_i32 = src.astype(jnp.int32)                                # (L,)

    # --- lane-dense projection operands --------------------------------------
    w_padded = jnp.zeros((Cp, E), jnp.float32).at[:C, :].set(fc_w.astype(jnp.float32))
    b_padded = jnp.zeros((1, Cp), jnp.float32).at[0, :C].set(fc_b.astype(jnp.float32))

    # Rows are gathered as (1, E) blocks; the unit sublane dim keeps all dynamic
    # indexing on the untiled leading axis.
    emb3 = emb_table.astype(jnp.float32).reshape(V, 1, E)

    # --- static path selection ------------------------------------------------
    # Resident layout cost: each (1, E) row pads to an (8, round_up(E,128)) tile.
    resident_table_bytes = V * SUBLANES * _round_up(E, LANES) * 4
    weights_bytes = (w_padded.size + b_padded.size) * 4
    resident_need = (2 * resident_table_bytes + 2 * weights_bytes
                     + 4 * TB * Cp * 4 + (1 << 20))
    RESIDENT_BUDGET = 24 << 20    # conservative across v5e/v6e and v7x (64 MiB VMEM)
    if table_path == "resident":
        use_resident = True
    elif table_path == "hbm":
        use_resident = False
    else:
        use_resident = resident_need <= RESIDENT_BUDGET

    grid = (B_pad // TB,)
    out_shape = jax.ShapeDtypeStruct((B_pad, Cp), jnp.float32)
    w_spec = pl.BlockSpec((Cp, E), lambda g, starts, src: (0, 0))
    b_spec = pl.BlockSpec((1, Cp), lambda g, starts, src: (0, 0))
    out_spec = pl.BlockSpec((TB, Cp), lambda g, starts, src: (g, 0))

    if use_resident:
        kernel = functools.partial(_embedbag_fc_kernel_resident,
                                   padding_idx=int(padding_idx), tb=TB)
        vmem_limit = int(resident_need) if resident_need > (16 << 20) else None
        out = pl.pallas_call(
            kernel,
            out_shape=out_shape,
            grid_spec=pltpu.PrefetchScalarGridSpec(
                num_scalar_prefetch=2,
                grid=grid,
                in_specs=[
                    # Whole table resident in VMEM (constant block index => one DMA).
                    pl.BlockSpec((V, 1, E), lambda g, starts, src: (0, 0, 0)),
                    w_spec, b_spec,
                ],
                out_specs=out_spec,
                scratch_shapes=[pltpu.VMEM((TB, E), jnp.float32)],
            ),
            compiler_params=pltpu.CompilerParams(
                dimension_semantics=("parallel",),
                vmem_limit_bytes=vmem_limit),
        )(starts_ext, src_i32, emb3, w_padded, b_padded)
    else:
        kernel = functools.partial(_embedbag_fc_kernel_hbm,
                                   padding_idx=int(padding_idx), tb=TB)
        out = pl.pallas_call(
            kernel,
            out_shape=out_shape,
            grid_spec=pltpu.PrefetchScalarGridSpec(
                num_scalar_prefetch=2,
                grid=grid,
                in_specs=[
                    pl.BlockSpec(memory_space=pl.ANY),   # table stays in HBM
                    w_spec, b_spec,
                ],
                out_specs=out_spec,
                scratch_shapes=[
                    pltpu.VMEM((TB, E), jnp.float32),     # per-tile bag means
                    pltpu.VMEM((1, E), jnp.float32),      # current bag sum
                    pltpu.SMEM((1,), jnp.int32),          # current bag non-pad count
                    pltpu.VMEM((2, 1, E), jnp.float32),   # double-buffered gathered row
                    pltpu.SemaphoreType.DMA((2,)),        # per-slot DMA completion
                ],
            ),
            compiler_params=pltpu.CompilerParams(
                dimension_semantics=("parallel",)),
        )(starts_ext, src_i32, emb3, w_padded, b_padded)

    return out[:B, :C]


# --------------------------- plain-JAX reference ------------------------------
def reference_forward(src, offsets, emb_table, fc_w, fc_b, padding_idx):
    L = src.shape[0]
    B = offsets.shape[0]
    ends = jnp.concatenate([offsets[1:], jnp.array([L], dtype=offsets.dtype)])
    outs = []
    for b in range(B):
        idx = src[int(offsets[b]):int(ends[b])]
        mask = (idx != padding_idx)
        vecs = emb_table[idx] * mask[:, None].astype(jnp.float32)
        cnt = jnp.maximum(mask.sum().astype(jnp.float32), 1.0)
        outs.append(vecs.sum(axis=0) / cnt)
    x = jnp.stack(outs, axis=0)                       # (B, E)
    return x @ fc_w.T + fc_b                          # (B, C)


# ----------------------------------- main -------------------------------------
if __name__ == "__main__":
    # Module hyperparameters (small, consistent with __init__ signature).
    input_features = 64      # vocab size V
    output_features = 8      # number of classes C
    embed_dim = 32           # E
    padding_idx = 0
    # hidden_dim = 256       # lin1/lin2/softmax are unused in forward (dead code)

    key = jax.random.PRNGKey(0)
    k_emb, k_w, k_b, k_src = jax.random.split(key, 4)
    emb_table = jax.random.normal(k_emb, (input_features, embed_dim),
                                  dtype=jnp.float32) * 0.1
    # EmbeddingBag keeps the padding_idx row at zero.
    emb_table = emb_table.at[padding_idx].set(0.0)
    fc_w = jax.random.normal(k_w, (output_features, embed_dim),
                             dtype=jnp.float32) * 0.1
    fc_b = jax.random.normal(k_b, (output_features,), dtype=jnp.float32) * 0.1

    # Flat token stream with B bags of varying length (one bag intentionally empty).
    L, B = 30, 6
    src = jax.random.randint(k_src, (L,), 0, input_features, dtype=jnp.int32)
    src = src.at[3].set(padding_idx).at[17].set(padding_idx).at[21].set(padding_idx)
    offsets = jnp.array([0, 5, 5, 12, 20, 26], dtype=jnp.int32)   # bag 1 is empty

    ref = reference_forward(src, offsets, emb_table, fc_w, fc_b, padding_idx)

    # Fast path (auto-selected at this table size): table resident in VMEM.
    out_res = text_classifier_forward(src, offsets, emb_table, fc_w, fc_b,
                                      padding_idx)
    # General path: table stays in HBM, manual double-buffered row gather.
    out_hbm = text_classifier_forward(src, offsets, emb_table, fc_w, fc_b,
                                      padding_idx, table_path="hbm")
    out_res, out_hbm = jax.block_until_ready((out_res, out_hbm))

    assert out_res.shape == (B, output_features)
    assert out_hbm.shape == (B, output_features)
    assert jnp.allclose(out_res, ref, atol=1e-5, rtol=1e-5), (out_res, ref)
    assert jnp.allclose(out_hbm, ref, atol=1e-5, rtol=1e-5), (out_hbm, ref)

    print("KERNEL_OK")
</pallas_src>

<mosaic_0001>
module attributes {stable_mosaic.version = 11 : i64} {
  func.func @_embedbag_fc_kernel_resident(%arg0: i32, %arg1: memref<9xi32, #tpu.memory_space<smem>>, %arg2: memref<30xi32, #tpu.memory_space<smem>>, %arg3: memref<64x1x32xf32, #tpu.memory_space<vmem>>, %arg4: memref<128x32xf32, #tpu.memory_space<vmem>>, %arg5: memref<1x128xf32, #tpu.memory_space<vmem>>, %arg6: memref<8x128xf32, #tpu.memory_space<vmem>>, %arg7: memref<8x32xf32, #tpu.memory_space<vmem>>) attributes {dimension_semantics = [#tpu.dimension_semantics<parallel>], iteration_bounds = array<i64: 1>, scalar_prefetch = 2 : i64, scratch_operands = 1 : i64, tpu.core_type = #tpu.core_type<tc>, window_params = [{pipeline_mode = #tpu.pipeline_mode<synchronous>, transform_indices = @transform_0, window_bounds = array<i64: 64, 1, 32>}, {pipeline_mode = #tpu.pipeline_mode<synchronous>, transform_indices = @transform_1, window_bounds = array<i64: 128, 32>}, {pipeline_mode = #tpu.pipeline_mode<synchronous>, transform_indices = @transform_2, window_bounds = array<i64: 1, 128>}, {transform_indices = @transform_3, window_bounds = array<i64: 8, 128>}]} {
    %c8_i32 = arith.constant 8 : i32
    %0 = arith.muli %arg0, %c8_i32 : i32
    %c0_i32 = arith.constant 0 : i32
    %1 = arith.addi %0, %c0_i32 : i32
    %2 = arith.index_cast %1 : i32 to index
    %3 = memref.load %arg1[%2] : memref<9xi32, #tpu.memory_space<smem>>
    %c0_i32_0 = arith.constant 0 : i32
    %4 = arith.addi %0, %c0_i32_0 : i32
    %c1_i32 = arith.constant 1 : i32
    %5 = arith.addi %4, %c1_i32 : i32
    %6 = arith.index_cast %5 : i32 to index
    %7 = memref.load %arg1[%6] : memref<9xi32, #tpu.memory_space<smem>>
    %8 = arith.subi %7, %3 : i32
    %cst = arith.constant 0.000000e+00 : f32
    %9 = vector.broadcast %cst : f32 to vector<1x32xf32>
    %c0_i32_1 = arith.constant 0 : i32
    %c0_i32_2 = arith.constant 0 : i32
    %10 = arith.subi %8, %c0_i32_1 : i32
    %11 = arith.addi %c0_i32_1, %10 : i32
    %c1_i32_3 = arith.constant 1 : i32
    %12:2 = scf.for %arg8 = %c0_i32_1 to %11 step %c1_i32_3 iter_args(%arg9 = %9, %arg10 = %c0_i32_2) -> (vector<1x32xf32>, i32)  : i32 {
      %152 = arith.addi %3, %arg8 : i32
      %153 = arith.index_cast %152 : i32 to index
      %154 = memref.load %arg2[%153] : memref<30xi32, #tpu.memory_space<smem>>
      %c0_i32_80 = arith.constant 0 : i32
      %155 = arith.cmpi ne, %154, %c0_i32_80 : i32
      %156 = arith.index_cast %154 : i32 to index
      %c0_81 = arith.constant 0 : index
      %c0_82 = arith.constant 0 : index
      %157 = vector.load %arg3[%156, %c0_81, %c0_82] : memref<64x1x32xf32, #tpu.memory_space<vmem>>, vector<1x1x32xf32>
      %158 = vector.shape_cast %157 : vector<1x1x32xf32> to vector<1x32xf32>
      %159 = arith.extui %155 : i1 to i32
      %160 = arith.sitofp %159 : i32 to f32
      %161 = vector.broadcast %160 : f32 to vector<1x32xf32>
      %162 = arith.mulf %158, %161 : vector<1x32xf32>
      %163 = arith.addf %arg9, %162 : vector<1x32xf32>
      %164 = arith.extui %155 : i1 to i32
      %165 = arith.addi %arg10, %164 : i32
      scf.yield %163, %165 : vector<1x32xf32>, i32
    }
    %c1_i32_4 = arith.constant 1 : i32
    %13 = arith.maxsi %12#1, %c1_i32_4 : i32
    %14 = arith.sitofp %13 : i32 to f32
    %cst_5 = arith.constant 1.000000e+00 : f32
    %15 = arith.divf %cst_5, %14 : f32
    %16 = vector.broadcast %15 : f32 to vector<1x32xf32>
    %17 = arith.mulf %12#0, %16 : vector<1x32xf32>
    %c0 = arith.constant 0 : index
    %c0_6 = arith.constant 0 : index
    %18 = vector.load %arg7[%c0, %c0_6] : memref<8x32xf32, #tpu.memory_space<vmem>>, vector<1x32xf32>
    tpu.vector_store %arg7[%c0, %c0_6], %17 {strides = array<i32>} : memref<8x32xf32, #tpu.memory_space<vmem>>, vector<1x32xf32>,
    %c1_i32_7 = arith.constant 1 : i32
    %19 = arith.addi %0, %c1_i32_7 : i32
    %20 = arith.index_cast %19 : i32 to index
    %21 = memref.load %arg1[%20] : memref<9xi32, #tpu.memory_space<smem>>
    %c1_i32_8 = arith.constant 1 : i32
    %22 = arith.addi %0, %c1_i32_8 : i32
    %c1_i32_9 = arith.constant 1 : i32
    %23 = arith.addi %22, %c1_i32_9 : i32
    %24 = arith.index_cast %23 : i32 to index
    %25 = memref.load %arg1[%24] : memref<9xi32, #tpu.memory_space<smem>>
    %26 = arith.subi %25, %21 : i32
    %cst_10 = arith.constant 0.000000e+00 : f32
    %27 = vector.broadcast %cst_10 : f32 to vector<1x32xf32>
    %c0_i32_11 = arith.constant 0 : i32
    %c0_i32_12 = arith.constant 0 : i32
    %28 = arith.subi %26, %c0_i32_11 : i32
    %29 = arith.addi %c0_i32_11, %28 : i32
    %c1_i32_13 = arith.constant 1 : i32
    %30:2 = scf.for %arg8 = %c0_i32_11 to %29 step %c1_i32_13 iter_args(%arg9 = %27, %arg10 = %c0_i32_12) -> (vector<1x32xf32>, i32)  : i32 {
      %152 = arith.addi %21, %arg8 : i32
      %153 = arith.index_cast %152 : i32 to index
      %154 = memref.load %arg2[%153] : memref<30xi32, #tpu.memory_space<smem>>
      %c0_i32_80 = arith.constant 0 : i32
      %155 = arith.cmpi ne, %154, %c0_i32_80 : i32
      %156 = arith.index_cast %154 : i32 to index
      %c0_81 = arith.constant 0 : index
      %c0_82 = arith.constant 0 : index
      %157 = vector.load %arg3[%156, %c0_81, %c0_82] : memref<64x1x32xf32, #tpu.memory_space<vmem>>, vector<1x1x32xf32>
      %158 = vector.shape_cast %157 : vector<1x1x32xf32> to vector<1x32xf32>
      %159 = arith.extui %155 : i1 to i32
      %160 = arith.sitofp %159 : i32 to f32
      %161 = vector.broadcast %160 : f32 to vector<1x32xf32>
      %162 = arith.mulf %158, %161 : vector<1x32xf32>
      %163 = arith.addf %arg9, %162 : vector<1x32xf32>
      %164 = arith.extui %155 : i1 to i32
      %165 = arith.addi %arg10, %164 : i32
      scf.yield %163, %165 : vector<1x32xf32>, i32
    }
    %c1_i32_14 = arith.constant 1 : i32
    %31 = arith.maxsi %30#1, %c1_i32_14 : i32
    %32 = arith.sitofp %31 : i32 to f32
    %cst_15 = arith.constant 1.000000e+00 : f32
    %33 = arith.divf %cst_15, %32 : f32
    %34 = vector.broadcast %33 : f32 to vector<1x32xf32>
    %35 = arith.mulf %30#0, %34 : vector<1x32xf32>
    %c1 = arith.constant 1 : index
    %c0_16 = arith.constant 0 : index
    %36 = vector.load %arg7[%c1, %c0_16] : memref<8x32xf32, #tpu.memory_space<vmem>>, vector<1x32xf32>
    tpu.vector_store %arg7[%c1, %c0_16], %35 {strides = array<i32>} : memref<8x32xf32, #tpu.memory_space<vmem>>, vector<1x32xf32>,
    %c2_i32 = arith.constant 2 : i32
    %37 = arith.addi %0, %c2_i32 : i32
    %38 = arith.index_cast %37 : i32 to index
    %39 = memref.load %arg1[%38] : memref<9xi32, #tpu.memory_space<smem>>
    %c2_i32_17 = arith.constant 2 : i32
    %40 = arith.addi %0, %c2_i32_17 : i32
    %c1_i32_18 = arith.constant 1 : i32
    %41 = arith.addi %40, %c1_i32_18 : i32
    %42 = arith.index_cast %41 : i32 to index
    %43 = memref.load %arg1[%42] : memref<9xi32, #tpu.memory_space<smem>>
    %44 = arith.subi %43, %39 : i32
    %cst_19 = arith.constant 0.000000e+00 : f32
    %45 = vector.broadcast %cst_19 : f32 to vector<1x32xf32>
    %c0_i32_20 = arith.constant 0 : i32
    %c0_i32_21 = arith.constant 0 : i32
    %46 = arith.subi %44, %c0_i32_20 : i32
    %47 = arith.addi %c0_i32_20, %46 : i32
    %c1_i32_22 = arith.constant 1 : i32
    %48:2 = scf.for %arg8 = %c0_i32_20 to %47 step %c1_i32_22 iter_args(%arg9 = %45, %arg10 = %c0_i32_21) -> (vector<1x32xf32>, i32)  : i32 {
      %152 = arith.addi %39, %arg8 : i32
      %153 = arith.index_cast %152 : i32 to index
      %154 = memref.load %arg2[%153] : memref<30xi32, #tpu.memory_space<smem>>
      %c0_i32_80 = arith.constant 0 : i32
      %155 = arith.cmpi ne, %154, %c0_i32_80 : i32
      %156 = arith.index_cast %154 : i32 to index
      %c0_81 = arith.constant 0 : index
      %c0_82 = arith.constant 0 : index
      %157 = vector.load %arg3[%156, %c0_81, %c0_82] : memref<64x1x32xf32, #tpu.memory_space<vmem>>, vector<1x1x32xf32>
      %158 = vector.shape_cast %157 : vector<1x1x32xf32> to vector<1x32xf32>
      %159 = arith.extui %155 : i1 to i32
      %160 = arith.sitofp %159 : i32 to f32
      %161 = vector.broadcast %160 : f32 to vector<1x32xf32>
      %162 = arith.mulf %158, %161 : vector<1x32xf32>
      %163 = arith.addf %arg9, %162 : vector<1x32xf32>
      %164 = arith.extui %155 : i1 to i32
      %165 = arith.addi %arg10, %164 : i32
      scf.yield %163, %165 : vector<1x32xf32>, i32
    }
    %c1_i32_23 = arith.constant 1 : i32
    %49 = arith.maxsi %48#1, %c1_i32_23 : i32
    %50 = arith.sitofp %49 : i32 to f32
    %cst_24 = arith.constant 1.000000e+00 : f32
    %51 = arith.divf %cst_24, %50 : f32
    %52 = vector.broadcast %51 : f32 to vector<1x32xf32>
    %53 = arith.mulf %48#0, %52 : vector<1x32xf32>
    %c2 = arith.constant 2 : index
    %c0_25 = arith.constant 0 : index
    %54 = vector.load %arg7[%c2, %c0_25] : memref<8x32xf32, #tpu.memory_space<vmem>>, vector<1x32xf32>
    tpu.vector_store %arg7[%c2, %c0_25], %53 {strides = array<i32>} : memref<8x32xf32, #tpu.memory_space<vmem>>, vector<1x32xf32>,
    %c3_i32 = arith.constant 3 : i32
    %55 = arith.addi %0, %c3_i32 : i32
    %56 = arith.index_cast %55 : i32 to index
    %57 = memref.load %arg1[%56] : memref<9xi32, #tpu.memory_space<smem>>
    %c3_i32_26 = arith.constant 3 : i32
    %58 = arith.addi %0, %c3_i32_26 : i32
    %c1_i32_27 = arith.constant 1 : i32
    %59 = arith.addi %58, %c1_i32_27 : i32
    %60 = arith.index_cast %59 : i32 to index
    %61 = memref.load %arg1[%60] : memref<9xi32, #tpu.memory_space<smem>>
    %62 = arith.subi %61, %57 : i32
    %cst_28 = arith.constant 0.000000e+00 : f32
    %63 = vector.broadcast %cst_28 : f32 to vector<1x32xf32>
    %c0_i32_29 = arith.constant 0 : i32
    %c0_i32_30 = arith.constant 0 : i32
    %64 = arith.subi %62, %c0_i32_29 : i32
    %65 = arith.addi %c0_i32_29, %64 : i32
    %c1_i32_31 = arith.constant 1 : i32
    %66:2 = scf.for %arg8 = %c0_i32_29 to %65 step %c1_i32_31 iter_args(%arg9 = %63, %arg10 = %c0_i32_30) -> (vector<1x32xf32>, i32)  : i32 {
      %152 = arith.addi %57, %arg8 : i32
      %153 = arith.index_cast %152 : i32 to index
      %154 = memref.load %arg2[%153] : memref<30xi32, #tpu.memory_space<smem>>
      %c0_i32_80 = arith.constant 0 : i32
      %155 = arith.cmpi ne, %154, %c0_i32_80 : i32
      %156 = arith.index_cast %154 : i32 to index
      %c0_81 = arith.constant 0 : index
      %c0_82 = arith.constant 0 : index
      %157 = vector.load %arg3[%156, %c0_81, %c0_82] : memref<64x1x32xf32, #tpu.memory_space<vmem>>, vector<1x1x32xf32>
      %158 = vector.shape_cast %157 : vector<1x1x32xf32> to vector<1x32xf32>
      %159 = arith.extui %155 : i1 to i32
      %160 = arith.sitofp %159 : i32 to f32
      %161 = vector.broadcast %160 : f32 to vector<1x32xf32>
      %162 = arith.mulf %158, %161 : vector<1x32xf32>
      %163 = arith.addf %arg9, %162 : vector<1x32xf32>
      %164 = arith.extui %155 : i1 to i32
      %165 = arith.addi %arg10, %164 : i32
      scf.yield %163, %165 : vector<1x32xf32>, i32
    }
    %c1_i32_32 = arith.constant 1 : i32
    %67 = arith.maxsi %66#1, %c1_i32_32 : i32
    %68 = arith.sitofp %67 : i32 to f32
    %cst_33 = arith.constant 1.000000e+00 : f32
    %69 = arith.divf %cst_33, %68 : f32
    %70 = vector.broadcast %69 : f32 to vector<1x32xf32>
    %71 = arith.mulf %66#0, %70 : vector<1x32xf32>
    %c3 = arith.constant 3 : index
    %c0_34 = arith.constant 0 : index
    %72 = vector.load %arg7[%c3, %c0_34] : memref<8x32xf32, #tpu.memory_space<vmem>>, vector<1x32xf32>
    tpu.vector_store %arg7[%c3, %c0_34], %71 {strides = array<i32>} : memref<8x32xf32, #tpu.memory_space<vmem>>, vector<1x32xf32>,
    %c4_i32 = arith.constant 4 : i32
    %73 = arith.addi %0, %c4_i32 : i32
    %74 = arith.index_cast %73 : i32 to index
    %75 = memref.load %arg1[%74] : memref<9xi32, #tpu.memory_space<smem>>
    %c4_i32_35 = arith.constant 4 : i32
    %76 = arith.addi %0, %c4_i32_35 : i32
    %c1_i32_36 = arith.constant 1 : i32
    %77 = arith.addi %76, %c1_i32_36 : i32
    %78 = arith.index_cast %77 : i32 to index
    %79 = memref.load %arg1[%78] : memref<9xi32, #tpu.memory_space<smem>>
    %80 = arith.subi %79, %75 : i32
    %cst_37 = arith.constant 0.000000e+00 : f32
    %81 = vector.broadcast %cst_37 : f32 to vector<1x32xf32>
    %c0_i32_38 = arith.constant 0 : i32
    %c0_i32_39 = arith.constant 0 : i32
    %82 = arith.subi %80, %c0_i32_38 : i32
    %83 = arith.addi %c0_i32_38, %82 : i32
    %c1_i32_40 = arith.constant 1 : i32
    %84:2 = scf.for %arg8 = %c0_i32_38 to %83 step %c1_i32_40 iter_args(%arg9 = %81, %arg10 = %c0_i32_39) -> (vector<1x32xf32>, i32)  : i32 {
      %152 = arith.addi %75, %arg8 : i32
      %153 = arith.index_cast %152 : i32 to index
      %154 = memref.load %arg2[%153] : memref<30xi32, #tpu.memory_space<smem>>
      %c0_i32_80 = arith.constant 0 : i32
      %155 = arith.cmpi ne, %154, %c0_i32_80 : i32
      %156 = arith.index_cast %154 : i32 to index
      %c0_81 = arith.constant 0 : index
      %c0_82 = arith.constant 0 : index
      %157 = vector.load %arg3[%156, %c0_81, %c0_82] : memref<64x1x32xf32, #tpu.memory_space<vmem>>, vector<1x1x32xf32>
      %158 = vector.shape_cast %157 : vector<1x1x32xf32> to vector<1x32xf32>
      %159 = arith.extui %155 : i1 to i32
      %160 = arith.sitofp %159 : i32 to f32
      %161 = vector.broadcast %160 : f32 to vector<1x32xf32>
      %162 = arith.mulf %158, %161 : vector<1x32xf32>
      %163 = arith.addf %arg9, %162 : vector<1x32xf32>
      %164 = arith.extui %155 : i1 to i32
      %165 = arith.addi %arg10, %164 : i32
      scf.yield %163, %165 : vector<1x32xf32>, i32
    }
    %c1_i32_41 = arith.constant 1 : i32
    %85 = arith.maxsi %84#1, %c1_i32_41 : i32
    %86 = arith.sitofp %85 : i32 to f32
    %cst_42 = arith.constant 1.000000e+00 : f32
    %87 = arith.divf %cst_42, %86 : f32
    %88 = vector.broadcast %87 : f32 to vector<1x32xf32>
    %89 = arith.mulf %84#0, %88 : vector<1x32xf32>
    %c4 = arith.constant 4 : index
    %c0_43 = arith.constant 0 : index
    %90 = vector.load %arg7[%c4, %c0_43] : memref<8x32xf32, #tpu.memory_space<vmem>>, vector<1x32xf32>
    tpu.vector_store %arg7[%c4, %c0_43], %89 {strides = array<i32>} : memref<8x32xf32, #tpu.memory_space<vmem>>, vector<1x32xf32>,
    %c5_i32 = arith.constant 5 : i32
    %91 = arith.addi %0, %c5_i32 : i32
    %92 = arith.index_cast %91 : i32 to index
    %93 = memref.load %arg1[%92] : memref<9xi32, #tpu.memory_space<smem>>
    %c5_i32_44 = arith.constant 5 : i32
    %94 = arith.addi %0, %c5_i32_44 : i32
    %c1_i32_45 = arith.constant 1 : i32
    %95 = arith.addi %94, %c1_i32_45 : i32
    %96 = arith.index_cast %95 : i32 to index
    %97 = memref.load %arg1[%96] : memref<9xi32, #tpu.memory_space<smem>>
    %98 = arith.subi %97, %93 : i32
    %cst_46 = arith.constant 0.000000e+00 : f32
    %99 = vector.broadcast %cst_46 : f32 to vector<1x32xf32>
    %c0_i32_47 = arith.constant 0 : i32
    %c0_i32_48 = arith.constant 0 : i32
    %100 = arith.subi %98, %c0_i32_47 : i32
    %101 = arith.addi %c0_i32_47, %100 : i32
    %c1_i32_49 = arith.constant 1 : i32
    %102:2 = scf.for %arg8 = %c0_i32_47 to %101 step %c1_i32_49 iter_args(%arg9 = %99, %arg10 = %c0_i32_48) -> (vector<1x32xf32>, i32)  : i32 {
      %152 = arith.addi %93, %arg8 : i32
      %153 = arith.index_cast %152 : i32 to index
      %154 = memref.load %arg2[%153] : memref<30xi32, #tpu.memory_space<smem>>
      %c0_i32_80 = arith.constant 0 : i32
      %155 = arith.cmpi ne, %154, %c0_i32_80 : i32
      %156 = arith.index_cast %154 : i32 to index
      %c0_81 = arith.constant 0 : index
      %c0_82 = arith.constant 0 : index
      %157 = vector.load %arg3[%156, %c0_81, %c0_82] : memref<64x1x32xf32, #tpu.memory_space<vmem>>, vector<1x1x32xf32>
      %158 = vector.shape_cast %157 : vector<1x1x32xf32> to vector<1x32xf32>
      %159 = arith.extui %155 : i1 to i32
      %160 = arith.sitofp %159 : i32 to f32
      %161 = vector.broadcast %160 : f32 to vector<1x32xf32>
      %162 = arith.mulf %158, %161 : vector<1x32xf32>
      %163 = arith.addf %arg9, %162 : vector<1x32xf32>
      %164 = arith.extui %155 : i1 to i32
      %165 = arith.addi %arg10, %164 : i32
      scf.yield %163, %165 : vector<1x32xf32>, i32
    }
    %c1_i32_50 = arith.constant 1 : i32
    %103 = arith.maxsi %102#1, %c1_i32_50 : i32
    %104 = arith.sitofp %103 : i32 to f32
    %cst_51 = arith.constant 1.000000e+00 : f32
    %105 = arith.divf %cst_51, %104 : f32
    %106 = vector.broadcast %105 : f32 to vector<1x32xf32>
    %107 = arith.mulf %102#0, %106 : vector<1x32xf32>
    %c5 = arith.constant 5 : index
    %c0_52 = arith.constant 0 : index
    %108 = vector.load %arg7[%c5, %c0_52] : memref<8x32xf32, #tpu.memory_space<vmem>>, vector<1x32xf32>
    tpu.vector_store %arg7[%c5, %c0_52], %107 {strides = array<i32>} : memref<8x32xf32, #tpu.memory_space<vmem>>, vector<1x32xf32>,
    %c6_i32 = arith.constant 6 : i32
    %109 = arith.addi %0, %c6_i32 : i32
    %110 = arith.index_cast %109 : i32 to index
    %111 = memref.load %arg1[%110] : memref<9xi32, #tpu.memory_space<smem>>
    %c6_i32_53 = arith.constant 6 : i32
    %112 = arith.addi %0, %c6_i32_53 : i32
    %c1_i32_54 = arith.constant 1 : i32
    %113 = arith.addi %112, %c1_i32_54 : i32
    %114 = arith.index_cast %113 : i32 to index
    %115 = memref.load %arg1[%114] : memref<9xi32, #tpu.memory_space<smem>>
    %116 = arith.subi %115, %111 : i32
    %cst_55 = arith.constant 0.000000e+00 : f32
    %117 = vector.broadcast %cst_55 : f32 to vector<1x32xf32>
    %c0_i32_56 = arith.constant 0 : i32
    %c0_i32_57 = arith.constant 0 : i32
    %118 = arith.subi %116, %c0_i32_56 : i32
    %119 = arith.addi %c0_i32_56, %118 : i32
    %c1_i32_58 = arith.constant 1 : i32
    %120:2 = scf.for %arg8 = %c0_i32_56 to %119 step %c1_i32_58 iter_args(%arg9 = %117, %arg10 = %c0_i32_57) -> (vector<1x32xf32>, i32)  : i32 {
      %152 = arith.addi %111, %arg8 : i32
      %153 = arith.index_cast %152 : i32 to index
      %154 = memref.load %arg2[%153] : memref<30xi32, #tpu.memory_space<smem>>
      %c0_i32_80 = arith.constant 0 : i32
      %155 = arith.cmpi ne, %154, %c0_i32_80 : i32
      %156 = arith.index_cast %154 : i32 to index
      %c0_81 = arith.constant 0 : index
      %c0_82 = arith.constant 0 : index
      %157 = vector.load %arg3[%156, %c0_81, %c0_82] : memref<64x1x32xf32, #tpu.memory_space<vmem>>, vector<1x1x32xf32>
      %158 = vector.shape_cast %157 : vector<1x1x32xf32> to vector<1x32xf32>
      %159 = arith.extui %155 : i1 to i32
      %160 = arith.sitofp %159 : i32 to f32
      %161 = vector.broadcast %160 : f32 to vector<1x32xf32>
      %162 = arith.mulf %158, %161 : vector<1x32xf32>
      %163 = arith.addf %arg9, %162 : vector<1x32xf32>
      %164 = arith.extui %155 : i1 to i32
      %165 = arith.addi %arg10, %164 : i32
      scf.yield %163, %165 : vector<1x32xf32>, i32
    }
    %c1_i32_59 = arith.constant 1 : i32
    %121 = arith.maxsi %120#1, %c1_i32_59 : i32
    %122 = arith.sitofp %121 : i32 to f32
    %cst_60 = arith.constant 1.000000e+00 : f32
    %123 = arith.divf %cst_60, %122 : f32
    %124 = vector.broadcast %123 : f32 to vector<1x32xf32>
    %125 = arith.mulf %120#0, %124 : vector<1x32xf32>
    %c6 = arith.constant 6 : index
    %c0_61 = arith.constant 0 : index
    %126 = vector.load %arg7[%c6, %c0_61] : memref<8x32xf32, #tpu.memory_space<vmem>>, vector<1x32xf32>
    tpu.vector_store %arg7[%c6, %c0_61], %125 {strides = array<i32>} : memref<8x32xf32, #tpu.memory_space<vmem>>, vector<1x32xf32>,
    %c7_i32 = arith.constant 7 : i32
    %127 = arith.addi %0, %c7_i32 : i32
    %128 = arith.index_cast %127 : i32 to index
    %129 = memref.load %arg1[%128] : memref<9xi32, #tpu.memory_space<smem>>
    %c7_i32_62 = arith.constant 7 : i32
    %130 = arith.addi %0, %c7_i32_62 : i32
    %c1_i32_63 = arith.constant 1 : i32
    %131 = arith.addi %130, %c1_i32_63 : i32
    %132 = arith.index_cast %131 : i32 to index
    %133 = memref.load %arg1[%132] : memref<9xi32, #tpu.memory_space<smem>>
    %134 = arith.subi %133, %129 : i32
    %cst_64 = arith.constant 0.000000e+00 : f32
    %135 = vector.broadcast %cst_64 : f32 to vector<1x32xf32>
    %c0_i32_65 = arith.constant 0 : i32
    %c0_i32_66 = arith.constant 0 : i32
    %136 = arith.subi %134, %c0_i32_65 : i32
    %137 = arith.addi %c0_i32_65, %136 : i32
    %c1_i32_67 = arith.constant 1 : i32
    %138:2 = scf.for %arg8 = %c0_i32_65 to %137 step %c1_i32_67 iter_args(%arg9 = %135, %arg10 = %c0_i32_66) -> (vector<1x32xf32>, i32)  : i32 {
      %152 = arith.addi %129, %arg8 : i32
      %153 = arith.index_cast %152 : i32 to index
      %154 = memref.load %arg2[%153] : memref<30xi32, #tpu.memory_space<smem>>
      %c0_i32_80 = arith.constant 0 : i32
      %155 = arith.cmpi ne, %154, %c0_i32_80 : i32
      %156 = arith.index_cast %154 : i32 to index
      %c0_81 = arith.constant 0 : index
      %c0_82 = arith.constant 0 : index
      %157 = vector.load %arg3[%156, %c0_81, %c0_82] : memref<64x1x32xf32, #tpu.memory_space<vmem>>, vector<1x1x32xf32>
      %158 = vector.shape_cast %157 : vector<1x1x32xf32> to vector<1x32xf32>
      %159 = arith.extui %155 : i1 to i32
      %160 = arith.sitofp %159 : i32 to f32
      %161 = vector.broadcast %160 : f32 to vector<1x32xf32>
      %162 = arith.mulf %158, %161 : vector<1x32xf32>
      %163 = arith.addf %arg9, %162 : vector<1x32xf32>
      %164 = arith.extui %155 : i1 to i32
      %165 = arith.addi %arg10, %164 : i32
      scf.yield %163, %165 : vector<1x32xf32>, i32
    }
    %c1_i32_68 = arith.constant 1 : i32
    %139 = arith.maxsi %138#1, %c1_i32_68 : i32
    %140 = arith.sitofp %139 : i32 to f32
    %cst_69 = arith.constant 1.000000e+00 : f32
    %141 = arith.divf %cst_69, %140 : f32
    %142 = vector.broadcast %141 : f32 to vector<1x32xf32>
    %143 = arith.mulf %138#0, %142 : vector<1x32xf32>
    %c7 = arith.constant 7 : index
    %c0_70 = arith.constant 0 : index
    %144 = vector.load %arg7[%c7, %c0_70] : memref<8x32xf32, #tpu.memory_space<vmem>>, vector<1x32xf32>
    tpu.vector_store %arg7[%c7, %c0_70], %143 {strides = array<i32>} : memref<8x32xf32, #tpu.memory_space<vmem>>, vector<1x32xf32>,
    %c0_71 = arith.constant 0 : index
    %c0_72 = arith.constant 0 : index
    %145 = vector.load %arg7[%c0_71, %c0_72] : memref<8x32xf32, #tpu.memory_space<vmem>>, vector<8x32xf32>
    %c0_73 = arith.constant 0 : index
    %c0_74 = arith.constant 0 : index
    %146 = vector.load %arg4[%c0_73, %c0_74] : memref<128x32xf32, #tpu.memory_space<vmem>>, vector<128x32xf32>
    %cst_75 = arith.constant dense<0.000000e+00> : vector<8x128xf32>
    %147 = tpu.matmul %145, %146, %cst_75 {dimension_numbers = #tpu.dot_dimension_numbers<[1], [1], [0], [0], [0, 0, 1, 0], [], []>} : vector<8x32xf32>, vector<128x32xf32>, vector<8x128xf32> -> vector<8x128xf32>
    %c0_76 = arith.constant 0 : index
    %c0_77 = arith.constant 0 : index
    %148 = vector.load %arg5[%c0_76, %c0_77] : memref<1x128xf32, #tpu.memory_space<vmem>>, vector<1x128xf32>
    %149 = vector.broadcast %148 : vector<1x128xf32> to vector<8x128xf32>
    %150 = arith.addf %147, %149 : vector<8x128xf32>
    %c0_78 = arith.constant 0 : index
    %c0_79 = arith.constant 0 : index
    %151 = vector.load %arg6[%c0_78, %c0_79] : memref<8x128xf32, #tpu.memory_space<vmem>>, vector<8x128xf32>
    tpu.vector_store %arg6[%c0_78, %c0_79], %150 {strides = array<i32>} : memref<8x128xf32, #tpu.memory_space<vmem>>, vector<8x128xf32>,
    return
  }
  func.func @transform_0(%arg0: i32, %arg1: memref<9xi32, #tpu.memory_space<smem>>, %arg2: memref<30xi32, #tpu.memory_space<smem>>) -> (i32, i32, i32) {
    %c0_i32 = arith.constant 0 : i32
    %c0_i32_0 = arith.constant 0 : i32
    %c0_i32_1 = arith.constant 0 : i32
    %c0_i32_2 = arith.constant 0 : i32
    return %c0_i32, %c0_i32_0, %c0_i32_1 : i32, i32, i32
  }
  func.func @transform_1(%arg0: i32, %arg1: memref<9xi32, #tpu.memory_space<smem>>, %arg2: memref<30xi32, #tpu.memory_space<smem>>) -> (i32, i32) {
    %c0_i32 = arith.constant 0 : i32
    %c0_i32_0 = arith.constant 0 : i32
    %c0_i32_1 = arith.constant 0 : i32
    return %c0_i32, %c0_i32_0 : i32, i32
  }
  func.func @transform_2(%arg0: i32, %arg1: memref<9xi32, #tpu.memory_space<smem>>, %arg2: memref<30xi32, #tpu.memory_space<smem>>) -> (i32, i32) {
    %c0_i32 = arith.constant 0 : i32
    %c0_i32_0 = arith.constant 0 : i32
    %c0_i32_1 = arith.constant 0 : i32
    return %c0_i32, %c0_i32_0 : i32, i32
  }
  func.func @transform_3(%arg0: i32, %arg1: memref<9xi32, #tpu.memory_space<smem>>, %arg2: memref<30xi32, #tpu.memory_space<smem>>) -> (i32, i32) {
    %c0_i32 = arith.constant 0 : i32
    %c0_i32_0 = arith.constant 0 : i32
    return %arg0, %c0_i32 : i32, i32
  }
}

</mosaic_0001>

<bundles_post_ra>
// kernel: tpu_custom_call.1
= control target key start
LH: loop header
LB: loop body
LE: loop exit
PB: predicated region body
PF: predicated region fallthrough
CT: control target
= control target key end

     0   :  { %s1659_s0 = inlined_call_operand.vmem [shape: s32[9], index: 0, kind: input, shape index: {}]   ;;  %s1660_s2 = inlined_call_operand.vmem [shape: f32[64,1,32], index: 2, kind: input, shape index: {}]   ;;  %s1661_s3 = inlined_call_operand.vmem [shape: f32[128,32], index: 3, kind: input, shape index: {}]   ;;  %s1662_s4 = inlined_call_operand.vmem [shape: f32[1,128], index: 4, kind: input, shape index: {}]   ;;  %s1663_s5 = inlined_call_operand.hbm [shape: f32[8,128], index: 5, kind: output, shape index: {}]   ;;  %s1664_s1 = inlined_call_operand.vmem [shape: s32[30], index: 1, kind: input, shape index: {}]  }
   0x1   :  { %s10_s20 = sshll.u32 %s1659_s0, 4  ;;  %s14_s23 = sshll.u32 %s1664_s1, 4  ;;  %s11_s20 = int_to_ptr.vmem [resolvable:$true] %s10_s20  ;;  %s15_s23 = int_to_ptr.vmem [resolvable:$true] %s14_s23 }
   0x2   :  { %s1025_s24 = scalar_lea.vmem %s11_s20, 16  ;;  %p1030_p1 = scmp.lt.s32.totalorder %s11_s20, %s11_s20 }
   0x3   :  { %p1026_p0 = scmp.ne.s32.totalorder %s11_s20, %s1025_s24  ;;  %p1031_p2 = scmp.lt.s32.totalorder %s1025_s24, %s1025_s24 }
   0x5   :  { %p1032_p3 = por %p1031_p2, %p1030_p1 }
   0x7   :  { %p1033_p4 = pnand %p1032_p3, %p1026_p0 }
   0x9   :  { %1036 = shalt.err (!%p1033_p4)  }
   0xa   :  { %s1395_s25 = smov [#allocation4]   ;;  %s1037_s26 = scalar_lea.vmem %s15_s23, 16 }
   0xb   :  { %13 = dma.vmem_to_smem %s11_s20, 16, %s1395_s25, [#allocation3] }
   0xc   :  { %p1038_p5 = scmp.ne.s32.totalorder %s15_s23, %s1037_s26  ;;  %p1042_p6 = scmp.lt.s32.totalorder %s15_s23, %s15_s23 }
   0xd   :  { %p1043_p7 = scmp.lt.s32.totalorder %s1037_s26, %s1037_s26 }
   0xf   :  { %p1044_p8 = por %p1043_p7, %p1042_p6 }
  0x11   :  { %p1045_p9 = pnand %p1044_p8, %p1038_p5 }
  0x13   :  { %1048 = shalt.err (!%p1045_p9)  }
  0x14   :  { %s1396_s0 = smov [#allocation5]  }
  0x15   :  { %17 = dma.vmem_to_smem %s15_s23, 16, %s1396_s0, [#allocation3] }
  0x16   :  { %1231 = dma.done.wait [#allocation3], 32 }
  0x17   :  { %1232 = vsyncadd [#allocation3], 4294967264 }
  0x18   :  { %19 = sfence }
  0x19   :  { %20 = vsyncpa [#allocation7], 0  ;;  %s1437_s1 = sld [smem:[#allocation4]]  ;;  %s542_s27 = sld [smem:[#allocation4 + $0x1]]  ;;  %v1251_v0 = vmov 0.0  }
  0x1a   :  { %s1443_s29 = smov 0  }
  0x1f   :  { %s1440_s28 = ssub.s32 %s542_s27, %s1437_s1 }
  0x20   :  { %p543_p10 = scmp.le.s32.totalorder %s1440_s28, 0 }
  0x21   :  { %s1235_s30 = smov (!%p543_p10), 0   ;;  %v1239_v1 = vmov (!%p543_p10), 0.0   ;;  %s1243_s6 = smov (!%p543_p10), 0  }
  0x22   :  { %458 = sbr.rel (%p543_p10) target bundleno = 60 (0x3c), region = 90 }
  0x29 LB: > { %s40_s7 = sadd.s32 %s1245_s6, %s1437_s1  ;;  %s35_s6 = sadd.s32 1, %s1245_s6   ;;  %s1245_s6 = sphi %s1243_s6, %s35_s6   ;;  %v1241_v1 = vphi %v1239_v1, %v1240_v1   ;;  %s1237_s30 = sphi %s1235_s30, %s1236_s30  }
  0x2a   : > { %s41_s8 = sld [smem:[#allocation5 + %s40_s7]]  ;;  %p34_p12 = scmp.ge.s32.totalorder %s35_s6, %s1440_s28 }
  0x30   : > { %p42_p11 = scmp.ne.s32.totalorder %s41_s8, 0  ;;  %s43_s11 = scalar_lea.vmem %s1660_s2, %s41_s8 }
  0x31   : > { %v44_v2 = vld [vmem:[%s43_s11] sm:$0x1] }
  0x32   : > { %s45_s12 = scalar_select %p42_p11, 1, 0 }
  0x34   : > { %s46_s13 = scvt.s32.f32 %s45_s12  ;;  %s50_s14 = sadd.s32 %s1237_s30, %s45_s12  }
  0x35   : > { %s1236_s30 = smov %s50_s14   ;;  %37 = sbr.rel (!%p34_p12) target bundleno = 41 (0x29), region = 96 }
  0x36   : > { %v47_v3 = vstv %s46_s13  ;;  %s1665_s29 = smov (%p34_p12), %s50_s14 }
  0x37   : > { %v48_v4 = vmul.f32 %v47_v3, %v44_v2 }
  0x39   : > { %v49_v5 = vadd.f32 %v1241_v1, %v48_v4  }
  0x3b   : > { %v1240_v1 = vmov %v49_v5   ;;  %v1252_v0 = vmov (%p34_p12), %v49_v5  }
  0x3c PF:  { %p51_p13 = scmp.gt.s32.totalorder %s1249_s29, 1  ;;  %s1453_s15 = sld [smem:[#allocation4 + $0x1]]  ;;  %vm59_vm0 = vcmask 253952   ;;  %v1271_v10 = vmov 0.0   ;;  %v1253_v0 = vphi %v1251_v0, %v1252_v0   ;;  %s1249_s29 = sphi %s1443_s29, %s1665_s29  }
  0x3d   :  { %s545_s16 = sld [smem:[#allocation4 + $0x2]]  ;;  %s1460_s20 = smov 0  }
  0x3e   :  { %s1676_s29 = smov (!%p51_p13, %s1249_s29), 1 }
  0x3f   :  { %s53_s17 = scvt.s32.f32 %s1676_s29 }
  0x41   :  { %v54_v6 = vstv %s53_s17 }
  0x42   :  { %1009 = vrcp.f32 %v54_v6 }
  0x43   :  { %s1456_s18 = ssub.s32 %s545_s16, %s1453_s15 }
  0x44   :  { %p546_p0 = scmp.le.s32.totalorder %s1456_s18, 0 }
  0x45   :  { %s1255_s21 = smov (!%p546_p0), 0   ;;  %v1259_v11 = vmov (!%p546_p0), 0.0   ;;  %s1263_s22 = smov (!%p546_p0), 0  }
  0x4c   :  { %v1010_v7 = vpop.eup %1009 }
  0x4d   :  { %667 = vpush %v1010_v7 }
  0x7c   :  { %469 = sbr.rel (%p546_p0) target bundleno = 150 (0x96), region = 101 }
  0x7e   :  { %s668_s19 = spop %667 }
  0x7f   :  { %v57_v8 = vstv %s668_s19 }
  0x80   :  { %v58_v9 = vmul.f32 %v1253_v0, %v57_v8 }
  0x82   :  { %60 = vst.msk [vmem:[#allocation2] sm:$0x1] %vm59_vm0, %v58_v9 }
  0x83 LB: > { %s73_s23 = sadd.s32 %s1265_s22, %s1453_s15  ;;  %s68_s22 = sadd.s32 1, %s1265_s22   ;;  %s1265_s22 = sphi %s1263_s22, %s68_s22   ;;  %v1261_v11 = vphi %v1259_v11, %v1260_v11   ;;  %s1257_s21 = sphi %s1255_s21, %s1256_s21  }
  0x84   : > { %s74_s24 = sld [smem:[#allocation5 + %s73_s23]]  ;;  %p67_p2 = scmp.ge.s32.totalorder %s68_s22, %s1456_s18 }
  0x8a   : > { %p75_p1 = scmp.ne.s32.totalorder %s74_s24, 0  ;;  %s76_s0 = scalar_lea.vmem %s1660_s2, %s74_s24 }
  0x8b   : > { %v77_v12 = vld [vmem:[%s76_s0] sm:$0x1] }
  0x8c   : > { %s78_s1 = scalar_select %p75_p1, 1, 0 }
  0x8e   : > { %s79_s27 = scvt.s32.f32 %s78_s1  ;;  %s83_s28 = sadd.s32 %s1257_s21, %s78_s1  }
  0x8f   : > { %s1256_s21 = smov %s83_s28   ;;  %70 = sbr.rel (!%p67_p2) target bundleno = 131 (0x83), region = 107 }
  0x90   : > { %v80_v13 = vstv %s79_s27  ;;  %s1666_s20 = smov (%p67_p2), %s83_s28 }
  0x91   : > { %v81_v14 = vmul.f32 %v80_v13, %v77_v12 }
  0x93   : > { %v82_v15 = vadd.f32 %v1261_v11, %v81_v14  }
  0x95   : > { %v1260_v11 = vmov %v82_v15   ;;  %v1272_v10 = vmov (%p67_p2), %v82_v15  }
  0x96 PF:  { %p84_p3 = scmp.gt.s32.totalorder %s1269_s20, 1  ;;  %s1470_s29 = sld [smem:[#allocation4 + $0x2]]  ;;  %v1291_v20 = vmov 0.0   ;;  %v1273_v10 = vphi %v1271_v10, %v1272_v10   ;;  %s1269_s20 = sphi %s1460_s20, %s1666_s20  }
  0x97   :  { %s548_s30 = sld [smem:[#allocation4 + $0x3]]  ;;  %s1477_s9 = smov 0  }
  0x98   :  { %s1678_s20 = smov (!%p84_p3, %s1269_s20), 1 }
  0x99   :  { %s86_s6 = scvt.s32.f32 %s1678_s20 }
  0x9b   :  { %v87_v16 = vstv %s86_s6 }
  0x9c   :  { %1011 = vrcp.f32 %v87_v16 }
  0x9d   :  { %s1473_s7 = ssub.s32 %s548_s30, %s1470_s29 }
  0x9e   :  { %p549_p4 = scmp.le.s32.totalorder %s1473_s7, 0 }
  0x9f   :  { %s1275_s10 = smov (!%p549_p4), 0   ;;  %v1279_v21 = vmov (!%p549_p4), 0.0   ;;  %s1283_s11 = smov (!%p549_p4), 0  }
  0xa6   :  { %v1012_v17 = vpop.eup %1011 }
  0xa7   :  { %669 = vpush %v1012_v17 }
  0xd6   :  { %480 = sbr.rel (%p549_p4) target bundleno = 240 (0xf0), region = 112 }
  0xd8   :  { %s670_s8 = spop %669 }
  0xd9   :  { %v90_v18 = vstv %s670_s8 }
  0xda   :  { %v91_v19 = vmul.f32 %v1273_v10, %v90_v18 }
  0xdc   :  { %92 = vst.msk [vmem:[#allocation2 + $0x1] sm:$0x1] %vm59_vm0, %v91_v19 }
  0xdd LB: > { %s105_s12 = sadd.s32 %s1285_s11, %s1470_s29  ;;  %s100_s11 = sadd.s32 1, %s1285_s11   ;;  %s1285_s11 = sphi %s1283_s11, %s100_s11   ;;  %v1281_v21 = vphi %v1279_v21, %v1280_v21   ;;  %s1277_s10 = sphi %s1275_s10, %s1276_s10  }
  0xde   : > { %s106_s13 = sld [smem:[#allocation5 + %s105_s12]]  ;;  %p99_p6 = scmp.ge.s32.totalorder %s100_s11, %s1473_s7 }
  0xe4   : > { %p107_p5 = scmp.ne.s32.totalorder %s106_s13, 0  ;;  %s108_s16 = scalar_lea.vmem %s1660_s2, %s106_s13 }
  0xe5   : > { %v109_v22 = vld [vmem:[%s108_s16] sm:$0x1] }
  0xe6   : > { %s110_s17 = scalar_select %p107_p5, 1, 0 }
  0xe8   : > { %s111_s18 = scvt.s32.f32 %s110_s17  ;;  %s115_s19 = sadd.s32 %s1277_s10, %s110_s17  }
  0xe9   : > { %s1276_s10 = smov %s115_s19   ;;  %102 = sbr.rel (!%p99_p6) target bundleno = 221 (0xdd), region = 118 }
  0xea   : > { %v112_v23 = vstv %s111_s18  ;;  %s1667_s9 = smov (%p99_p6), %s115_s19 }
  0xeb   : > { %v113_v24 = vmul.f32 %v112_v23, %v109_v22 }
  0xed   : > { %v114_v25 = vadd.f32 %v1281_v21, %v113_v24  }
  0xef   : > { %v1280_v21 = vmov %v114_v25   ;;  %v1292_v20 = vmov (%p99_p6), %v114_v25  }
  0xf0 PF:  { %p116_p7 = scmp.gt.s32.totalorder %s1289_s9, 1  ;;  %s1487_s20 = sld [smem:[#allocation4 + $0x3]]  ;;  %v1311_v30 = vmov 0.0   ;;  %v1293_v20 = vphi %v1291_v20, %v1292_v20   ;;  %s1289_s9 = sphi %s1477_s9, %s1667_s9  }
  0xf1   :  { %s551_s21 = sld [smem:[#allocation4 + $0x4]]  ;;  %s1494_s25 = smov 0  }
  0xf2   :  { %s1680_s9 = smov (!%p116_p7, %s1289_s9), 1 }
  0xf3   :  { %s118_s22 = scvt.s32.f32 %s1680_s9 }
  0xf5   :  { %v119_v26 = vstv %s118_s22 }
  0xf6   :  { %1013 = vrcp.f32 %v119_v26 }
  0xf7   :  { %s1490_s23 = ssub.s32 %s551_s21, %s1487_s20 }
  0xf8   :  { %p552_p8 = scmp.le.s32.totalorder %s1490_s23, 0 }
  0xf9   :  { %s1295_s26 = smov (!%p552_p8), 0   ;;  %v1299_v31 = vmov (!%p552_p8), 0.0   ;;  %s1303_s0 = smov (!%p552_p8), 0  }
 0x100   :  { %v1014_v27 = vpop.eup %1013 }
 0x101   :  { %671 = vpush %v1014_v27 }
 0x130   :  { %491 = sbr.rel (%p552_p8) target bundleno = 330 (0x14a), region = 123 }
 0x132   :  { %s672_s24 = spop %671 }
 0x133   :  { %v122_v28 = vstv %s672_s24 }
 0x134   :  { %v123_v29 = vmul.f32 %v1293_v20, %v122_v28 }
 0x136   :  { %124 = vst.msk [vmem:[#allocation2 + $0x2] sm:$0x1] %vm59_vm0, %v123_v29 }
 0x137 LB: > { %s137_s1 = sadd.s32 %s1305_s0, %s1487_s20  ;;  %s132_s0 = sadd.s32 1, %s1305_s0   ;;  %s1305_s0 = sphi %s1303_s0, %s132_s0   ;;  %v1301_v31 = vphi %v1299_v31, %v1300_v31   ;;  %s1297_s26 = sphi %s1295_s26, %s1296_s26  }
 0x138   : > { %s138_s27 = sld [smem:[#allocation5 + %s137_s1]]  ;;  %p131_p10 = scmp.ge.s32.totalorder %s132_s0, %s1490_s23 }
 0x13e   : > { %p139_p9 = scmp.ne.s32.totalorder %s138_s27, 0  ;;  %s140_s30 = scalar_lea.vmem %s1660_s2, %s138_s27 }
 0x13f   : > { %v141_v32 = vld [vmem:[%s140_s30] sm:$0x1] }
 0x140   : > { %s142_s6 = scalar_select %p139_p9, 1, 0 }
 0x142   : > { %s143_s7 = scvt.s32.f32 %s142_s6  ;;  %s147_s8 = sadd.s32 %s1297_s26, %s142_s6  }
 0x143   : > { %s1296_s26 = smov %s147_s8   ;;  %134 = sbr.rel (!%p131_p10) target bundleno = 311 (0x137), region = 129 }
 0x144   : > { %v144_v33 = vstv %s143_s7  ;;  %s1668_s25 = smov (%p131_p10), %s147_s8 }
 0x145   : > { %v145_v34 = vmul.f32 %v144_v33, %v141_v32 }
 0x147   : > { %v146_v35 = vadd.f32 %v1301_v31, %v145_v34  }
 0x149   : > { %v1300_v31 = vmov %v146_v35   ;;  %v1312_v30 = vmov (%p131_p10), %v146_v35  }
 0x14a PF:  { %p148_p11 = scmp.gt.s32.totalorder %s1309_s25, 1  ;;  %s1504_s9 = sld [smem:[#allocation4 + $0x4]]  ;;  %v1331_v40 = vmov 0.0   ;;  %v1313_v30 = vphi %v1311_v30, %v1312_v30   ;;  %s1309_s25 = sphi %s1494_s25, %s1668_s25  }
 0x14b   :  { %s554_s10 = sld [smem:[#allocation4 + $0x5]]  ;;  %s1511_s14 = smov 0  }
 0x14c   :  { %s1682_s25 = smov (!%p148_p11, %s1309_s25), 1 }
 0x14d   :  { %s150_s11 = scvt.s32.f32 %s1682_s25 }
 0x14f   :  { %v151_v36 = vstv %s150_s11 }
 0x150   :  { %1015 = vrcp.f32 %v151_v36 }
 0x151   :  { %s1507_s12 = ssub.s32 %s554_s10, %s1504_s9 }
 0x152   :  { %p555_p12 = scmp.le.s32.totalorder %s1507_s12, 0 }
 0x153   :  { %s1315_s15 = smov (!%p555_p12), 0   ;;  %v1319_v41 = vmov (!%p555_p12), 0.0   ;;  %s1323_s16 = smov (!%p555_p12), 0  }
 0x15a   :  { %v1016_v37 = vpop.eup %1015 }
 0x15b   :  { %673 = vpush %v1016_v37 }
 0x18a   :  { %502 = sbr.rel (%p555_p12) target bundleno = 420 (0x1a4), region = 134 }
 0x18c   :  { %s674_s13 = spop %673 }
 0x18d   :  { %v154_v38 = vstv %s674_s13 }
 0x18e   :  { %v155_v39 = vmul.f32 %v1313_v30, %v154_v38 }
 0x190   :  { %156 = vst.msk [vmem:[#allocation2 + $0x3] sm:$0x1] %vm59_vm0, %v155_v39 }
 0x191 LB: > { %s169_s17 = sadd.s32 %s1325_s16, %s1504_s9  ;;  %s164_s16 = sadd.s32 1, %s1325_s16   ;;  %s1325_s16 = sphi %s1323_s16, %s164_s16   ;;  %v1321_v41 = vphi %v1319_v41, %v1320_v41   ;;  %s1317_s15 = sphi %s1315_s15, %s1316_s15  }
 0x192   : > { %s170_s18 = sld [smem:[#allocation5 + %s169_s17]]  ;;  %p163_p0 = scmp.ge.s32.totalorder %s164_s16, %s1507_s12 }
 0x198   : > { %p171_p13 = scmp.ne.s32.totalorder %s170_s18, 0  ;;  %s172_s21 = scalar_lea.vmem %s1660_s2, %s170_s18 }
 0x199   : > { %v173_v42 = vld [vmem:[%s172_s21] sm:$0x1] }
 0x19a   : > { %s174_s22 = scalar_select %p171_p13, 1, 0 }
 0x19c   : > { %s175_s23 = scvt.s32.f32 %s174_s22  ;;  %s179_s24 = sadd.s32 %s1317_s15, %s174_s22  }
 0x19d   : > { %s1316_s15 = smov %s179_s24   ;;  %166 = sbr.rel (!%p163_p0) target bundleno = 401 (0x191), region = 140 }
 0x19e   : > { %v176_v43 = vstv %s175_s23  ;;  %s1669_s14 = smov (%p163_p0), %s179_s24 }
 0x19f   : > { %v177_v44 = vmul.f32 %v176_v43, %v173_v42 }
 0x1a1   : > { %v178_v45 = vadd.f32 %v1321_v41, %v177_v44  }
 0x1a3   : > { %v1320_v41 = vmov %v178_v45   ;;  %v1332_v40 = vmov (%p163_p0), %v178_v45  }
 0x1a4 PF:  { %p180_p1 = scmp.gt.s32.totalorder %s1329_s14, 1  ;;  %s1521_s25 = sld [smem:[#allocation4 + $0x5]]  ;;  %v1351_v50 = vmov 0.0   ;;  %v1333_v40 = vphi %v1331_v40, %v1332_v40   ;;  %s1329_s14 = sphi %s1511_s14, %s1669_s14  }
 0x1a5   :  { %s557_s26 = sld [smem:[#allocation4 + $0x6]]  ;;  %s1528_s28 = smov 0  }
 0x1a6   :  { %s1684_s14 = smov (!%p180_p1, %s1329_s14), 1 }
 0x1a7   :  { %s182_s0 = scvt.s32.f32 %s1684_s14 }
 0x1a9   :  { %v183_v46 = vstv %s182_s0 }
 0x1aa   :  { %1017 = vrcp.f32 %v183_v46 }
 0x1ab   :  { %s1524_s1 = ssub.s32 %s557_s26, %s1521_s25 }
 0x1ac   :  { %p558_p2 = scmp.le.s32.totalorder %s1524_s1, 0 }
 0x1ad   :  { %s1335_s29 = smov (!%p558_p2), 0   ;;  %v1339_v51 = vmov (!%p558_p2), 0.0   ;;  %s1343_s30 = smov (!%p558_p2), 0  }
 0x1b4   :  { %v1018_v47 = vpop.eup %1017 }
 0x1b5   :  { %675 = vpush %v1018_v47 }
 0x1e4   :  { %513 = sbr.rel (%p558_p2) target bundleno = 510 (0x1fe), region = 145 }
 0x1e6   :  { %s676_s27 = spop %675 }
 0x1e7   :  { %v186_v48 = vstv %s676_s27 }
 0x1e8   :  { %v187_v49 = vmul.f32 %v1333_v40, %v186_v48 }
 0x1ea   :  { %188 = vst.msk [vmem:[#allocation2 + $0x4] sm:$0x1] %vm59_vm0, %v187_v49 }
 0x1eb LB: > { %s201_s6 = sadd.s32 %s1345_s30, %s1521_s25  ;;  %s196_s30 = sadd.s32 1, %s1345_s30   ;;  %s1345_s30 = sphi %s1343_s30, %s196_s30   ;;  %v1341_v51 = vphi %v1339_v51, %v1340_v51   ;;  %s1337_s29 = sphi %s1335_s29, %s1336_s29  }
 0x1ec   : > { %s202_s7 = sld [smem:[#allocation5 + %s201_s6]]  ;;  %p195_p4 = scmp.ge.s32.totalorder %s196_s30, %s1524_s1 }
 0x1f2   : > { %p203_p3 = scmp.ne.s32.totalorder %s202_s7, 0  ;;  %s204_s10 = scalar_lea.vmem %s1660_s2, %s202_s7 }
 0x1f3   : > { %v205_v52 = vld [vmem:[%s204_s10] sm:$0x1] }
 0x1f4   : > { %s206_s11 = scalar_select %p203_p3, 1, 0 }
 0x1f6   : > { %s207_s12 = scvt.s32.f32 %s206_s11  ;;  %s211_s13 = sadd.s32 %s1337_s29, %s206_s11  }
 0x1f7   : > { %s1336_s29 = smov %s211_s13   ;;  %198 = sbr.rel (!%p195_p4) target bundleno = 491 (0x1eb), region = 151 }
 0x1f8   : > { %v208_v53 = vstv %s207_s12  ;;  %s1670_s28 = smov (%p195_p4), %s211_s13 }
 0x1f9   : > { %v209_v54 = vmul.f32 %v208_v53, %v205_v52 }
 0x1fb   : > { %v210_v55 = vadd.f32 %v1341_v51, %v209_v54  }
 0x1fd   : > { %v1340_v51 = vmov %v210_v55   ;;  %v1352_v50 = vmov (%p195_p4), %v210_v55  }
 0x1fe PF:  { %p212_p5 = scmp.gt.s32.totalorder %s1349_s28, 1  ;;  %s1538_s14 = sld [smem:[#allocation4 + $0x6]]  ;;  %v1371_v60 = vmov 0.0   ;;  %v1353_v50 = vphi %v1351_v50, %v1352_v50   ;;  %s1349_s28 = sphi %s1528_s28, %s1670_s28  }
 0x1ff   :  { %s560_s15 = sld [smem:[#allocation4 + $0x7]]  ;;  %s1545_s19 = smov 0  }
 0x200   :  { %s1686_s28 = smov (!%p212_p5, %s1349_s28), 1 }
 0x201   :  { %s214_s16 = scvt.s32.f32 %s1686_s28 }
 0x203   :  { %v215_v56 = vstv %s214_s16 }
 0x204   :  { %1019 = vrcp.f32 %v215_v56 }
 0x205   :  { %s1541_s17 = ssub.s32 %s560_s15, %s1538_s14 }
 0x206   :  { %p561_p6 = scmp.le.s32.totalorder %s1541_s17, 0 }
 0x207   :  { %s1355_s20 = smov (!%p561_p6), 0   ;;  %v1359_v61 = vmov (!%p561_p6), 0.0   ;;  %s1363_s21 = smov (!%p561_p6), 0  }
 0x20e   :  { %v1020_v57 = vpop.eup %1019 }
 0x20f   :  { %677 = vpush %v1020_v57 }
 0x23e   :  { %524 = sbr.rel (%p561_p6) target bundleno = 600 (0x258), region = 156 }
 0x240   :  { %s678_s18 = spop %677 }
 0x241   :  { %v218_v58 = vstv %s678_s18 }
 0x242   :  { %v219_v59 = vmul.f32 %v1353_v50, %v218_v58 }
 0x244   :  { %220 = vst.msk [vmem:[#allocation2 + $0x5] sm:$0x1] %vm59_vm0, %v219_v59 }
 0x245 LB: > { %s233_s22 = sadd.s32 %s1365_s21, %s1538_s14  ;;  %s228_s21 = sadd.s32 1, %s1365_s21   ;;  %s1365_s21 = sphi %s1363_s21, %s228_s21   ;;  %v1361_v61 = vphi %v1359_v61, %v1360_v61   ;;  %s1357_s20 = sphi %s1355_s20, %s1356_s20  }
 0x246   : > { %s234_s23 = sld [smem:[#allocation5 + %s233_s22]]  ;;  %p227_p8 = scmp.ge.s32.totalorder %s228_s21, %s1541_s17 }
 0x24c   : > { %p235_p7 = scmp.ne.s32.totalorder %s234_s23, 0  ;;  %s236_s26 = scalar_lea.vmem %s1660_s2, %s234_s23 }
 0x24d   : > { %v237_v62 = vld [vmem:[%s236_s26] sm:$0x1] }
 0x24e   : > { %s238_s0 = scalar_select %p235_p7, 1, 0 }
 0x250   : > { %s239_s1 = scvt.s32.f32 %s238_s0  ;;  %s243_s27 = sadd.s32 %s1357_s20, %s238_s0  }
 0x251   : > { %s1356_s20 = smov %s243_s27   ;;  %230 = sbr.rel (!%p227_p8) target bundleno = 581 (0x245), region = 162 }
 0x252   : > { %v240_v63 = vstv %s239_s1  ;;  %s1671_s19 = smov (%p227_p8), %s243_s27 }
 0x253   : > { %v241_v0 = vmul.f32 %v240_v63, %v237_v62 }
 0x255   : > { %v242_v1 = vadd.f32 %v1361_v61, %v241_v0  }
 0x257   : > { %v1360_v61 = vmov %v242_v1   ;;  %v1372_v60 = vmov (%p227_p8), %v242_v1  }
 0x258 PF:  { %p244_p9 = scmp.gt.s32.totalorder %s1369_s19, 1  ;;  %s1555_s28 = sld [smem:[#allocation4 + $0x7]]  ;;  %v1391_v6 = vmov 0.0   ;;  %v1373_v60 = vphi %v1371_v60, %v1372_v60   ;;  %s1369_s19 = sphi %s1545_s19, %s1671_s19  }
 0x259   :  { %s563_s29 = sld [smem:[#allocation4 + $0x8]]  ;;  %s1562_s8 = smov 0  }
 0x25a   :  { %s1688_s19 = smov (!%p244_p9, %s1369_s19), 1 }
 0x25b   :  { %s246_s30 = scvt.s32.f32 %s1688_s19 }
 0x25d   :  { %v247_v2 = vstv %s246_s30 }
 0x25e   :  { %1021 = vrcp.f32 %v247_v2 }
 0x25f   :  { %s1558_s6 = ssub.s32 %s563_s29, %s1555_s28 }
 0x260   :  { %p564_p10 = scmp.le.s32.totalorder %s1558_s6, 0 }
 0x261   :  { %s1375_s9 = smov (!%p564_p10), 0   ;;  %v1379_v7 = vmov (!%p564_p10), 0.0   ;;  %s1383_s10 = smov (!%p564_p10), 0  }
 0x268   :  { %v1022_v3 = vpop.eup %1021 }
 0x269   :  { %679 = vpush %v1022_v3 }
 0x298   :  { %535 = sbr.rel (%p564_p10) target bundleno = 690 (0x2b2), region = 167 }
 0x29a   :  { %s680_s7 = spop %679 }
 0x29b   :  { %v250_v4 = vstv %s680_s7 }
 0x29c   :  { %v251_v5 = vmul.f32 %v1373_v60, %v250_v4 }
 0x29e   :  { %252 = vst.msk [vmem:[#allocation2 + $0x6] sm:$0x1] %vm59_vm0, %v251_v5 }
 0x29f LB: > { %s265_s11 = sadd.s32 %s1385_s10, %s1555_s28  ;;  %s260_s10 = sadd.s32 1, %s1385_s10   ;;  %s1385_s10 = sphi %s1383_s10, %s260_s10   ;;  %v1381_v7 = vphi %v1379_v7, %v1380_v7   ;;  %s1377_s9 = sphi %s1375_s9, %s1376_s9  }
 0x2a0   : > { %s266_s12 = sld [smem:[#allocation5 + %s265_s11]]  ;;  %p259_p12 = scmp.ge.s32.totalorder %s260_s10, %s1558_s6 }
 0x2a6   : > { %p267_p11 = scmp.ne.s32.totalorder %s266_s12, 0  ;;  %s268_s15 = scalar_lea.vmem %s1660_s2, %s266_s12 }
 0x2a7   : > { %v269_v8 = vld [vmem:[%s268_s15] sm:$0x1] }
 0x2a8   : > { %s270_s16 = scalar_select %p267_p11, 1, 0 }
 0x2aa   : > { %s271_s17 = scvt.s32.f32 %s270_s16  ;;  %s275_s18 = sadd.s32 %s1377_s9, %s270_s16  }
 0x2ab   : > { %s1376_s9 = smov %s275_s18   ;;  %262 = sbr.rel (!%p259_p12) target bundleno = 671 (0x29f), region = 173 }
 0x2ac   : > { %v272_v9 = vstv %s271_s17  ;;  %s1672_s8 = smov (%p259_p12), %s275_s18 }
 0x2ad   : > { %v273_v10 = vmul.f32 %v272_v9, %v269_v8 }
 0x2af   : > { %v274_v11 = vadd.f32 %v1381_v7, %v273_v10  }
 0x2b1   : > { %v1380_v7 = vmov %v274_v11   ;;  %v1392_v6 = vmov (%p259_p12), %v274_v11  }
 0x2b2 PF:  { %v286_v12 = vld [vmem:[%s1661_s3] sm:$0xff]  ;;  %v287_v13 = vld [vmem:[%s1661_s3 + $0x8] sm:$0xff]  ;;  %vm309_vm1 = vcmask 261120   ;;  %p276_p13 = scmp.gt.s32.totalorder %s1389_s8, 1  ;;  %v1397_v14 = vmov 0.0|0.0   ;;  %vm1398_vm3 = vmmov 0   ;;  %v1393_v6 = vphi %v1391_v6, %v1392_v6   ;;  %s1389_s8 = sphi %s1562_s8, %s1672_s8  }
 0x2b3   :  { %635 = vmatprep.subr.bf16.mxu0 %v1397_v14  ;;  %v636_v15 = vpack.c.bf16 %v287_v13, %v286_v12  ;;  %vm1580_vm2 = vmpackc.low %vm309_vm1, %vm309_vm1  ;;  %v1399_v17 = vmov 0.0   ;;  %v288_v18 = vld [vmem:[%s1661_s3 + $0x10] sm:$0xff]  ;;  %v289_v19 = vld [vmem:[%s1661_s3 + $0x18] sm:$0xff]  ;;  %s1400_s26 = smov [#allocation6]  }
 0x2b4   :  { %s1690_s8 = smov (!%p276_p13, %s1389_s8), 1  ;;  %632 = vmatprep.mubr.msk.f32.mxu0 %vm1398_vm3, %v1399_v17  ;;  %v640_v21 = vpack.c.bf16 %v289_v19, %v288_v18  ;;  %v290_v22 = vld [vmem:[%s1661_s3 + $0x20] sm:$0xff]  ;;  %v291_v23 = vld [vmem:[%s1661_s3 + $0x28] sm:$0xff]  ;;  %v292_v26 = vld [vmem:[%s1661_s3 + $0x30] sm:$0xff]  ;;  %s438_s0 = sshll.u32 %s1400_s26, 4  ;;  %s439_s0 = int_to_ptr.vmem [resolvable:$true] %s438_s0 }
 0x2b5   :  { %638 = vmatpush3.bf16.xpose.msk.msra.mxu0 %vm1580_vm2, %v636_v15  ;;  %s278_s2 = scvt.s32.f32 %s1690_s8  ;;  %v644_v24 = vpack.c.bf16 %v291_v23, %v290_v22  ;;  %v293_v27 = vld [vmem:[%s1661_s3 + $0x38] sm:$0xff]  ;;  %v294_v29 = vld [vmem:[%s1661_s3 + $0x40] sm:$0xff]  ;;  %v295_v30 = vld [vmem:[%s1661_s3 + $0x48] sm:$0xff]  ;;  %p1054_p1 = scmp.lt.s32.totalorder %s439_s0, %s439_s0 }
 0x2b6   :  { %639 = vmatprep.subr.bf16.mxu0 %v1397_v14  ;;  %v648_v28 = vpack.c.bf16 %v293_v27, %v292_v26  ;;  %v652_v31 = vpack.c.bf16 %v295_v30, %v294_v29  ;;  %v296_v32 = vld [vmem:[%s1661_s3 + $0x50] sm:$0xff]  ;;  %v297_v33 = vld [vmem:[%s1661_s3 + $0x58] sm:$0xff]  ;;  %v298_v35 = vld [vmem:[%s1661_s3 + $0x60] sm:$0xff] }
 0x2b7   :  { %v279_v20 = vstv %s278_s2  ;;  %v656_v34 = vpack.c.bf16 %v297_v33, %v296_v32  ;;  %v299_v36 = vld [vmem:[%s1661_s3 + $0x68] sm:$0xff]  ;;  %v300_v38 = vld [vmem:[%s1661_s3 + $0x70] sm:$0xff]  ;;  %v301_v39 = vld [vmem:[%s1661_s3 + $0x78] sm:$0xff]  ;;  %s1049_s3 = scalar_lea.vmem %s439_s0, 128 }
 0x2b8   :  { %1023 = vrcp.f32 %v279_v20  ;;  %v660_v37 = vpack.c.bf16 %v299_v36, %v298_v35  ;;  %v664_v40 = vpack.c.bf16 %v301_v39, %v300_v38  ;;  %v565_v44 = vld [vmem:[%s1662_s4] ss:$0 sm:$0xff]  ;;  %p1050_p0 = scmp.ne.s32.totalorder %s439_s0, %s1049_s3  ;;  %p1055_p2 = scmp.lt.s32.totalorder %s1049_s3, %s1049_s3 }
 0x2ba   :  { %p1056_p3 = por %p1055_p2, %p1054_p1 }
 0x2bc   :  { %p1057_p4 = pnand %p1056_p3, %p1050_p0 }
 0x2bd   :  { %642 = vmatpush3.bf16.xpose.msk.msra.mxu0 %vm1580_vm2, %v640_v21 }
 0x2be   :  { %643 = vmatprep.subr.bf16.mxu0 %v1397_v14 }
 0x2c2   :  { %v1024_v25 = vpop.eup %1023 }
 0x2c3   :  { %681 = vpush %v1024_v25 }
 0x2c5   :  { %646 = vmatpush3.bf16.xpose.msk.msra.mxu0 %vm1580_vm2, %v644_v24 }
 0x2c6   :  { %647 = vmatprep.subr.bf16.mxu0 %v1397_v14 }
 0x2cd   :  { %650 = vmatpush3.bf16.xpose.msk.msra.mxu0 %vm1580_vm2, %v648_v28 }
 0x2ce   :  { %651 = vmatprep.subr.bf16.mxu0 %v1397_v14 }
 0x2d5   :  { %654 = vmatpush3.bf16.xpose.msk.msra.mxu0 %vm1580_vm2, %v652_v31 }
 0x2d6   :  { %655 = vmatprep.subr.bf16.mxu0 %v1397_v14 }
 0x2dd   :  { %658 = vmatpush3.bf16.xpose.msk.msra.mxu0 %vm1580_vm2, %v656_v34 }
 0x2de   :  { %659 = vmatprep.subr.bf16.mxu0 %v1397_v14 }
 0x2e5   :  { %662 = vmatpush3.bf16.xpose.msk.msra.mxu0 %vm1580_vm2, %v660_v37 }
 0x2e6   :  { %663 = vmatprep.subr.bf16.mxu0 %v1397_v14 }
 0x2ed   :  { %666 = vmatpush3.bf16.xpose.msk.msra.mxu0 %vm1580_vm2, %v664_v40 }
 0x2f4   :  { %s682_s23 = spop %681 }
 0x2f5   :  { %v282_v41 = vstv %s682_s23 }
 0x2f6   :  { %v283_v42 = vmul.f32 %v1393_v6, %v282_v41 }
 0x2f8   :  { %284 = vst.msk [vmem:[#allocation2 + $0x7] sm:$0x1] %vm59_vm0, %v283_v42 }
 0x2ff   :  { %v285_v43 = vld [vmem:[#allocation2] sm:$0xff] }
 0x300   :  { %633 = vmatmul.mubr.msk.f32.vlgmr.msra.gmra.mrb[0].mxu0 %vm309_vm1, %v285_v43 }
 0x3d3   :  { %v427_v45 = vpop.f32.mrb[0].mxu0 }
 0x3d4   :  { %v428_v46 = vadd.f32 %v565_v44, %v427_v45  ;;  %v634_v47 = vpop.f32.mrb[1].mxu0 }
 0x3d6   :  { %431 = vst [vmem:[#allocation6] sm:$0xff] %v428_v46 }
 0x3d7   :  { %1060 = shalt.err (!%p1057_p4)
}
 0x3d8   :  { %s1061_s28 = scalar_lea.hbm %s1663_s5, 128 }
 0x3d9   :  { %p1062_p5 = scmp.ne.s32.totalorder %s1663_s5, %s1061_s28  ;;  %p1065_p6 = scmp.lt.u32.totalorder %s1061_s28, %s1663_s5 }
 0x3db   :  { %p1067_p7 = pnand %p1065_p6, %p1062_p5 }
 0x3dd   :  { %1070 = shalt.err (!%p1067_p7)
}
 0x3de   :  { %441 = dma.vmem_to_hbm [thread:$0]  %s439_s0, 128, %s1663_s5, [#allocation7]  }
 0x3df   :  { %1233 = dma.done.wait [#allocation7], 128  }
 0x3e0   :  { %1234 = vsyncadd [#allocation7], 4294967168 }
 0x3e1   :  { %445 = vsyncpa [#allocation7], 1 }

</bundles_post_ra>
